<compile_context>
chip_gen: v5e
topology: v5e:2x2
jax: 0.10.0
libtpu: 0.0.40
codegen_flags: <defaults>
</compile_context>

<pallas_src>
import functools

import jax
import jax.numpy as jnp
from jax.experimental import pallas as pl
from jax.experimental.pallas import tpu as pltpu

_LANE = 128
_SUBLANE = 8
_MAX_BLOCK_ROWS = 512  # ~256 KiB per f32 input block -> ~1 MiB with 2x double-buffering


def _round_up(x: int, m: int) -> int:
    return ((x + m - 1) // m) * m


def _contrastive_loss_kernel(d_ref, l_ref, out_ref, acc_ref, *, margin: float, inv_n: float):
    # Zero the running sum on the first grid step.
    @pl.when(pl.program_id(0) == 0)
    def _init():
        acc_ref[...] = jnp.zeros_like(acc_ref)

    # Native-dtype tiles are cast to f32 in-vreg (free relative to saved HBM bytes).
    d = d_ref[...].astype(jnp.float32)            # (block_rows, 128)
    lab = l_ref[...].astype(jnp.float32)          # (block_rows, 128)

    loss_similar = lab * d * d
    clamped = jnp.maximum(jnp.float32(margin) - d, 0.0)
    loss_dissimilar = (1.0 - lab) * clamped * clamped
    loss = loss_similar + loss_dissimilar

    block_sum = jnp.sum(loss, axis=1, keepdims=True)       # lane reduce    -> (rows, 1)
    block_sum = jnp.sum(block_sum, axis=0, keepdims=True)  # sublane reduce -> (1, 1)
    acc_ref[...] += block_sum

    # Finalize: scale by 1/N and emit the scalar on the last grid step.
    @pl.when(pl.program_id(0) == pl.num_programs(0) - 1)
    def _finalize():
        out_ref[...] = acc_ref[...] * jnp.float32(inv_n)


def contrastive_loss(distance: jax.Array, label: jax.Array, margin: float = 1.0,
                     *, block_rows: int | None = None) -> jax.Array:
    """Pallas TPU equivalent of ContrastiveLoss(margin).forward(distance, label)."""
    assert distance.shape == label.shape
    n = int(distance.size)
    assert n > 0

    rows_needed = max(1, pl.cdiv(n, _LANE))
    if block_rows is None:
        block_rows = min(_MAX_BLOCK_ROWS, _round_up(rows_needed, _SUBLANE))
    block_rows = _round_up(int(block_rows), _SUBLANE)
    num_blocks = pl.cdiv(rows_needed, block_rows)
    rows_total = num_blocks * block_rows
    n_padded = rows_total * _LANE
    pad = n_padded - n

    # Padding with distance=0, label=1 contributes 0 to both loss terms.
    # Inputs stay in their native dtype -- no f32 upcast in HBM.
    d2 = jnp.pad(distance.reshape(-1), (0, pad), constant_values=0).reshape(rows_total, _LANE)
    l2 = jnp.pad(label.reshape(-1), (0, pad), constant_values=1).reshape(rows_total, _LANE)

    kernel = functools.partial(
        _contrastive_loss_kernel, margin=float(margin), inv_n=1.0 / float(n))

    out = pl.pallas_call(
        kernel,
        out_shape=jax.ShapeDtypeStruct((1, 1), jnp.float32),
        grid=(num_blocks,),
        in_specs=[
            pl.BlockSpec((block_rows, _LANE), lambda i: (i, 0)),
            pl.BlockSpec((block_rows, _LANE), lambda i: (i, 0)),
        ],
        out_specs=pl.BlockSpec((1, 1), lambda i: (0, 0)),
        scratch_shapes=[pltpu.VMEM((1, 1), jnp.float32)],
        compiler_params=pltpu.CompilerParams(
            dimension_semantics=("arbitrary",),       # chunk axis is a reduction
            vmem_limit_bytes=32 * 1024 * 1024,        # explicit; safe on v5e/v6e/v7x
        ),
    )(d2, l2)
    return out[0, 0]


def _reference_loss(distance, label, margin=1.0):
    d = distance.astype(jnp.float32)
    lab = label.astype(jnp.float32)
    loss_similar = lab * d**2
    loss_dissimilar = (1.0 - lab) * jnp.maximum(margin - d, 0.0) ** 2
    return jnp.mean(loss_similar + loss_dissimilar)


if __name__ == "__main__":
    key = jax.random.PRNGKey(0)
    k_d, k_l, k_d2, k_l2 = jax.random.split(key, 4)

    # --- Test 1: tiny batch (matches the module's typical use), f32 inputs ---
    batch = 8
    distance = jax.random.uniform(k_d, (batch,), dtype=jnp.float32, minval=0.0, maxval=2.0)
    label = jax.random.bernoulli(k_l, p=0.5, shape=(batch,)).astype(jnp.float32)

    loss = contrastive_loss(distance, label, margin=1.0)
    jax.block_until_ready(loss)
    ref = _reference_loss(distance, label, margin=1.0)
    assert jnp.allclose(loss, ref, atol=1e-6, rtol=1e-6), (loss, ref)

    # --- Test 2: multi-block grid path + bf16-in-HBM + padding correctness ---
    batch2 = 2500  # not a multiple of 128 -> exercises label=1 / distance=0 padding
    distance2 = jax.random.uniform(
        k_d2, (batch2,), dtype=jnp.float32, minval=0.0, maxval=2.0).astype(jnp.bfloat16)
    label2 = jax.random.bernoulli(k_l2, p=0.5, shape=(batch2,)).astype(jnp.bfloat16)

    loss2 = contrastive_loss(distance2, label2, margin=1.0, block_rows=8)  # grid of 3 blocks
    jax.block_until_ready(loss2)
    ref2 = _reference_loss(distance2, label2, margin=1.0)
    assert jnp.allclose(loss2, ref2, atol=1e-5, rtol=1e-5), (loss2, ref2)

    print("KERNEL_OK")
</pallas_src>

<mosaic_0001>
module attributes {stable_mosaic.version = 11 : i64} {
  func.func @_contrastive_loss_kernel(%arg0: i32, %arg1: memref<8x128xf32, #tpu.memory_space<vmem>>, %arg2: memref<8x128xf32, #tpu.memory_space<vmem>>, %arg3: memref<1x1xf32, #tpu.memory_space<vmem>>, %arg4: memref<1x1xf32, #tpu.memory_space<vmem>>) attributes {dimension_semantics = [#tpu.dimension_semantics<arbitrary>], iteration_bounds = array<i64: 1>, scalar_prefetch = 0 : i64, scratch_operands = 1 : i64, tpu.core_type = #tpu.core_type<tc>, window_params = [{transform_indices = @transform_0, window_bounds = array<i64: 8, 128>}, {transform_indices = @transform_1, window_bounds = array<i64: 8, 128>}, {pipeline_mode = #tpu.pipeline_mode<synchronous>, transform_indices = @transform_2, window_bounds = array<i64: 1, 1>}]} {
    %c0_i32 = arith.constant 0 : i32
    %0 = arith.cmpi eq, %arg0, %c0_i32 : i32
    %1 = arith.extui %0 : i1 to i32
    %c0_i32_0 = arith.constant 0 : i32
    %2 = arith.cmpi ne, %1, %c0_i32_0 : i32
    scf.if %2 {
      %cst_14 = arith.constant 0.000000e+00 : f32
      %26 = vector.broadcast %cst_14 : f32 to vector<1x1xf32>
      %c0_15 = arith.constant 0 : index
      %c0_16 = arith.constant 0 : index
      %27 = vector.load %arg4[%c0_15, %c0_16] : memref<1x1xf32, #tpu.memory_space<vmem>>, vector<1x1xf32>
      tpu.vector_store %arg4[%c0_15, %c0_16], %26 {strides = array<i32>} : memref<1x1xf32, #tpu.memory_space<vmem>>, vector<1x1xf32>,
    } else {
    }
    %c0 = arith.constant 0 : index
    %c0_1 = arith.constant 0 : index
    %3 = vector.load %arg1[%c0, %c0_1] : memref<8x128xf32, #tpu.memory_space<vmem>>, vector<8x128xf32>
    %c0_2 = arith.constant 0 : index
    %c0_3 = arith.constant 0 : index
    %4 = vector.load %arg2[%c0_2, %c0_3] : memref<8x128xf32, #tpu.memory_space<vmem>>, vector<8x128xf32>
    %5 = arith.mulf %4, %3 : vector<8x128xf32>
    %6 = arith.mulf %5, %3 : vector<8x128xf32>
    %cst = arith.constant 1.000000e+00 : f32
    %7 = vector.broadcast %cst : f32 to vector<8x128xf32>
    %8 = arith.subf %7, %3 : vector<8x128xf32>
    %cst_4 = arith.constant 0.000000e+00 : f32
    %9 = vector.broadcast %cst_4 : f32 to vector<8x128xf32>
    %10 = arith.maximumf %8, %9 : vector<8x128xf32>
    %cst_5 = arith.constant 1.000000e+00 : f32
    %11 = vector.broadcast %cst_5 : f32 to vector<8x128xf32>
    %12 = arith.subf %11, %4 : vector<8x128xf32>
    %13 = arith.mulf %12, %10 : vector<8x128xf32>
    %14 = arith.mulf %13, %10 : vector<8x128xf32>
    %15 = arith.addf %6, %14 : vector<8x128xf32>
    %cst_6 = arith.constant dense<0.000000e+00> : vector<8xf32>
    %16 = vector.multi_reduction <add>, %15, %cst_6 [1] : vector<8x128xf32> to vector<8xf32>
    %17 = vector.shape_cast %16 : vector<8xf32> to vector<8x1xf32>
    %cst_7 = arith.constant dense<0.000000e+00> : vector<1xf32>
    %18 = vector.multi_reduction <add>, %17, %cst_7 [0] : vector<8x1xf32> to vector<1xf32>
    %19 = vector.shape_cast %18 : vector<1xf32> to vector<1x1xf32>
    %c0_8 = arith.constant 0 : index
    %c0_9 = arith.constant 0 : index
    %20 = vector.load %arg4[%c0_8, %c0_9] : memref<1x1xf32, #tpu.memory_space<vmem>>, vector<1x1xf32>
    %21 = arith.addf %20, %19 : vector<1x1xf32>
    %c0_10 = arith.constant 0 : index
    %c0_11 = arith.constant 0 : index
    %22 = vector.load %arg4[%c0_10, %c0_11] : memref<1x1xf32, #tpu.memory_space<vmem>>, vector<1x1xf32>
    tpu.vector_store %arg4[%c0_10, %c0_11], %21 {strides = array<i32>} : memref<1x1xf32, #tpu.memory_space<vmem>>, vector<1x1xf32>,
    %c0_i32_12 = arith.constant 0 : i32
    %23 = arith.cmpi eq, %arg0, %c0_i32_12 : i32
    %24 = arith.extui %23 : i1 to i32
    %c0_i32_13 = arith.constant 0 : i32
    %25 = arith.cmpi ne, %24, %c0_i32_13 : i32
    scf.if %25 {
      %c0_14 = arith.constant 0 : index
      %c0_15 = arith.constant 0 : index
      %26 = vector.load %arg4[%c0_14, %c0_15] : memref<1x1xf32, #tpu.memory_space<vmem>>, vector<1x1xf32>
      %cst_16 = arith.constant 1.250000e-01 : f32
      %27 = vector.broadcast %cst_16 : f32 to vector<1x1xf32>
      %28 = arith.mulf %26, %27 : vector<1x1xf32>
      %c0_17 = arith.constant 0 : index
      %c0_18 = arith.constant 0 : index
      %29 = vector.load %arg3[%c0_17, %c0_18] : memref<1x1xf32, #tpu.memory_space<vmem>>, vector<1x1xf32>
      tpu.vector_store %arg3[%c0_17, %c0_18], %28 {strides = array<i32>} : memref<1x1xf32, #tpu.memory_space<vmem>>, vector<1x1xf32>,
    } else {
    }
    return
  }
  func.func @transform_0(%arg0: i32) -> (i32, i32) {
    %c0_i32 = arith.constant 0 : i32
    %c0_i32_0 = arith.constant 0 : i32
    return %arg0, %c0_i32 : i32, i32
  }
  func.func @transform_1(%arg0: i32) -> (i32, i32) {
    %c0_i32 = arith.constant 0 : i32
    %c0_i32_0 = arith.constant 0 : i32
    return %arg0, %c0_i32 : i32, i32
  }
  func.func @transform_2(%arg0: i32) -> (i32, i32) {
    %c0_i32 = arith.constant 0 : i32
    %c0_i32_0 = arith.constant 0 : i32
    %c0_i32_1 = arith.constant 0 : i32
    return %c0_i32, %c0_i32_0 : i32, i32
  }
}

</mosaic_0001>

<bundles_post_ra>
// kernel: tpu_custom_call.1
= control target key start
LH: loop header
LB: loop body
LE: loop exit
PB: predicated region body
PF: predicated region fallthrough
CT: control target
= control target key end

     0   :  { %7 = vsyncpa [#allocation4], 0  ;;  %s205_s0 = inlined_call_operand.hbm [shape: f32[8,128], index: 0, kind: input, shape index: {}]   ;;  %s206_s1 = inlined_call_operand.hbm [shape: f32[8,128], index: 1, kind: input, shape index: {}]   ;;  %s207_s2 = inlined_call_operand.hbm [shape: f32[1,1], index: 2, kind: output, shape index: {}]  }
   0x1   :  { %8 = vsyncpa [#allocation7], 0 }
   0x2   :  { %9 = vsyncpa [#allocation5], 0  ;;  %s15_s11 = sshll.u32 %s205_s0, 4  ;;  %s174_s12 = smov [#allocation3]   ;;  %s16_s11 = int_to_ptr.hbm [resolvable:$true] %s15_s11 }
   0x3   :  { %s17_s13 = sshll.u32 %s174_s12, 4  ;;  %s26_s16 = sshll.u32 %s206_s1, 4  ;;  %s18_s13 = int_to_ptr.vmem [resolvable:$true] %s17_s13  ;;  %s27_s16 = int_to_ptr.hbm [resolvable:$true] %s26_s16 }
   0x4   :  { %20 = dma.hbm_to_vmem [thread:$0]  %s16_s11, 128, %s18_s13, [#allocation4]  }
   0x5   :  { %s175_s17 = smov [#allocation6]  }
   0x6   :  { %s28_s18 = sshll.u32 %s175_s17, 4  ;;  %s29_s18 = int_to_ptr.vmem [resolvable:$true] %s28_s18 }
   0x7   :  { %31 = dma.hbm_to_vmem [thread:$0]  %s27_s16, 128, %s29_s18, [#allocation7]  }
   0x8   :  { %168 = dma.done.wait [#allocation4], 128  }
   0x9   :  { %169 = vsyncadd [#allocation4], 4294967168 }
   0xa   :  { %170 = dma.done.wait [#allocation7], 128  }
   0xb   :  { %171 = vsyncadd [#allocation7], 4294967168  ;;  %v46_v0 = vld [vmem:[#allocation3] sm:$0xff]  ;;  %v47_v1 = vld [vmem:[#allocation6] sm:$0xff]  ;;  %vm44_vm0 = vcmask 0   ;;  %v176_v10 = vmov 0.0  }
   0xc   :  { %v48_v2 = vmul.f32 %v47_v1, %v46_v0  ;;  %v50_v3 = vsub.f32 1.0, %v46_v0  ;;  %v52_v4 = vsub.f32 1.0, %v47_v1  ;;  %45 = vst.msk [vmem:[#allocation2] sm:$0x1] %vm44_vm0, %v176_v10  ;;  %s177_s0 = smov [#allocation8]   ;;  %s81_s21 = sshll.u32 %s207_s2, 4  ;;  %s82_s21 = int_to_ptr.hbm [resolvable:$true] %s81_s21 }
   0xd   :  { %s79_s1 = sshll.u32 %s177_s0, 4  ;;  %s80_s1 = int_to_ptr.vmem [resolvable:$true] %s79_s1 }
   0xe   :  { %v51_v5 = vmax.f32 %v50_v3, 0.0  ;;  %v49_v6 = vmul.f32 %v48_v2, %v46_v0 }
  0x10   :  { %v53_v7 = vmul.f32 %v52_v4, %v51_v5 }
  0x12   :  { %v54_v8 = vmul.f32 %v53_v7, %v51_v5 }
  0x13   :  { %v64_v17 = vld [vmem:[#allocation2] sm:$0x1] }
  0x14   :  { %v55_v9 = vadd.f32 %v54_v8, %v49_v6 }
  0x16   :  { %56 = vadd.xlane.f32.xlu0 %v55_v9 }
  0x89   :  { %v57_v11 = vpop.xlane.xlu0 %56 }
  0x8a   :  { %v58_v12 = vrot.slane %v57_v11, 4 }
  0x8c   :  { %v59_v13 = vadd.f32 %v58_v12, %v57_v11 }
  0x8e   :  { %v60_v14 = vrot.slane %v59_v13, 2 }
  0x90   :  { %v61_v15 = vadd.f32 %v60_v14, %v59_v13 }
  0x92   :  { %v62_v16 = vrot.slane %v61_v15, 1 }
  0x94   :  { %v63_v18 = vadd.f32 %v62_v16, %v61_v15 }
  0x96   :  { %v65_v19 = vadd.f32 %v64_v17, %v63_v18 }
  0x98   :  { %67 = vst.msk [vmem:[#allocation2] sm:$0x1] %vm44_vm0, %v65_v19 }
  0x9f   :  { %v71_v20 = vld [vmem:[#allocation2] sm:$0x1] }
  0xa0   :  { %v72_v21 = vmul.f32 0.125, %v71_v20 }
  0xa2   :  { %73 = vst.msk [vmem:[#allocation8] sm:$0x1] %vm44_vm0, %v72_v21 }
  0xa3   :  { %84 = dma.vmem_to_hbm [thread:$0]  %s80_s1, 16, %s82_s21, [#allocation5]  }
  0xa4   :  { %172 = dma.done.wait [#allocation5], 16  }
  0xa5   :  { %173 = vsyncadd [#allocation5], 4294967280 }
  0xa6   :  { %89 = vsyncpa [#allocation4], 1 }
  0xa7   :  { %90 = vsyncpa [#allocation7], 1 }
  0xa8   :  { %91 = vsyncpa [#allocation5], 1 }

</bundles_post_ra>
